<compile_context>
chip_gen: v6e
topology: v6e:2x2x1
jax: 0.10.0
libtpu: 0.0.40
codegen_flags: <defaults>
</compile_context>

<pallas_src>
from functools import partial

import jax
import jax.numpy as jnp
import numpy as np
from jax.experimental import pallas as pl
from jax.experimental.pallas import tpu as pltpu

LANES = 128
SUBLANES = 8
MAX_COLS = 4096  # widest lane-dense slab we target


def _sigmoid_bijector_kernel(x_ref, o_ref, *, scale, offset):
    # .astype is a no-op for f32; keeps f32 math for bf16 inputs.
    x = x_ref[...].astype(jnp.float32)
    # sigmoid(x) = 0.5 + 0.5*tanh(0.5*x); affine constants folded so that
    #   out = offset + scale * tanh(0.5 * x)
    o_ref[...] = (offset + scale * jnp.tanh(0.5 * x)).astype(o_ref.dtype)


def _chip_config():
    """(target_block_bytes, tensorcores_per_chip) from the device kind."""
    kind = ""
    try:
        kind = jax.devices()[0].device_kind.lower()
    except Exception:  # pragma: no cover - defensive
        pass
    two_cores = ("v7" in kind) or ("7x" in kind)
    if "v5e" in kind or "v5 lite" in kind or "v5lite" in kind:
        block_bytes = 2 << 20  # 4x2 MiB = 8 MiB << 16 MiB scoped VMEM
    elif "v6" in kind:
        block_bytes = 4 << 20  # 4x4 MiB = 16 MiB << 32 MiB scoped VMEM
    elif two_cores:
        block_bytes = 6 << 20  # 4x6 MiB = 24 MiB <= 32 MiB scoped VMEM
    else:
        block_bytes = 2 << 20  # conservative default for unknown chips
    return block_bytes, (2 if two_cores else 1)


def _row_tile(dtype):
    """Dtype-packed sublane tile: 8 for 4-byte, 16 for 2-byte, 32 for 1-byte."""
    itemsize = jnp.dtype(dtype).itemsize
    return max(SUBLANES, 32 // max(itemsize, 1))


def _choose_cols(n, row_tile):
    """Largest multiple of 128 (<= MAX_COLS) dividing n; prefer row-aligned rows."""
    best = 0
    best_aligned = 0
    c = LANES
    limit = min(MAX_COLS, n)
    while c <= limit:
        if n % c == 0:
            best = c
            if (n // c) % row_tile == 0:
                best_aligned = c
        c += LANES
    return best_aligned if best_aligned else best


def _block_rows(rows, cols, itemsize, row_tile, block_bytes, num_cores):
    bytes_per_row = cols * itemsize
    target = max(row_tile, (block_bytes // bytes_per_row) // row_tile * row_tile)
    tile_rows = min(rows, target)
    # v7x megacore: aim for >= 4 roughly equal, sublane-aligned grid steps so
    # both TensorCores get >= 2 pipelined steps. Single-TC chips keep 1 block.
    if num_cores >= 2 and rows >= 4 * row_tile:
        min_steps = 4
        if pl.cdiv(rows, tile_rows) < min_steps:
            per_step = pl.cdiv(rows, min_steps)
            tile_rows = max(row_tile, pl.cdiv(per_step, row_tile) * row_tile)
    return tile_rows


def _run_slab(flat, dtype, scale, offset, block_bytes, num_cores):
    """Run the kernel over a flat array whose length is a multiple of 128."""
    n = flat.shape[0]
    row_tile = _row_tile(dtype)
    cols = _choose_cols(n, row_tile)
    rows = n // cols
    itemsize = jnp.dtype(dtype).itemsize
    tile_rows = _block_rows(rows, cols, itemsize, row_tile, block_bytes, num_cores)
    grid = (pl.cdiv(rows, tile_rows),)

    kernel = partial(_sigmoid_bijector_kernel, scale=scale, offset=offset)
    out2d = pl.pallas_call(
        kernel,
        out_shape=jax.ShapeDtypeStruct((rows, cols), dtype),
        grid_spec=pltpu.PrefetchScalarGridSpec(
            num_scalar_prefetch=0,
            grid=grid,
            in_specs=[pl.BlockSpec((tile_rows, cols), lambda i: (i, 0))],
            out_specs=pl.BlockSpec((tile_rows, cols), lambda i: (i, 0)),
        ),
        compiler_params=pltpu.CompilerParams(
            dimension_semantics=("parallel",),
        ),
    )(flat.reshape(rows, cols))
    return out2d.reshape(-1)


def sigmoid_bijector_forward(x, min_value=0.0, max_value=1.0):
    """Elementwise forward of SigmoidBijector via a Pallas TPU kernel."""
    min_value = float(min_value)
    value_range = float(max_value) - min_value
    scale = 0.5 * value_range
    offset = min_value + 0.5 * value_range

    orig_shape = x.shape
    orig_dtype = x.dtype
    n = int(np.prod(orig_shape)) if len(orig_shape) else 1
    if n == 0:
        return x

    block_bytes, num_cores = _chip_config()
    flat = x.reshape(-1)  # contiguous reshape: free (no HBM pass)

    if n % LANES == 0:
        out = _run_slab(flat, orig_dtype, scale, offset, block_bytes, num_cores)
        return out.reshape(orig_shape)

    # Ragged path: kernel over the 128-aligned prefix, tiny (<128 elem) XLA
    # tail. Avoids the full-array jnp.pad + out[:n] slice HBM passes.
    def _xla_tail(v):
        s = min_value + value_range * jax.nn.sigmoid(v.astype(jnp.float32))
        return s.astype(orig_dtype)

    n_aligned = (n // LANES) * LANES
    if n_aligned == 0:
        return _xla_tail(flat).reshape(orig_shape)

    head = _run_slab(flat[:n_aligned], orig_dtype, scale, offset, block_bytes, num_cores)
    tail = _xla_tail(flat[n_aligned:])
    return jnp.concatenate([head, tail]).reshape(orig_shape)


if __name__ == "__main__":
    key = jax.random.PRNGKey(0)

    # Small NCHW-like input, consistent with a generic tensor input.
    x = jax.random.normal(key, (2, 4, 16, 16), dtype=jnp.float32) * 3.0
    min_value, max_value = -2.0, 3.0  # exercise non-default bounds

    out = sigmoid_bijector_forward(x, min_value=min_value, max_value=max_value)
    out = jax.block_until_ready(out)
    ref = min_value + (max_value - min_value) * jax.nn.sigmoid(x)
    assert out.shape == x.shape and out.dtype == x.dtype
    assert jnp.max(jnp.abs(out - ref)) < 1e-5

    # Ragged path: prefix through the kernel, <128-element tail via XLA.
    x2 = jax.random.normal(jax.random.PRNGKey(1), (5, 127), dtype=jnp.float32)
    out2 = jax.block_until_ready(sigmoid_bijector_forward(x2, 0.0, 1.0))
    ref2 = jax.nn.sigmoid(x2)
    assert out2.shape == x2.shape
    assert jnp.max(jnp.abs(out2 - ref2)) < 1e-5

    # bf16 input: exercises the dtype-packed (16-row) sublane tile logic.
    x3 = (jax.random.normal(jax.random.PRNGKey(2), (4, 8, 64)) * 2.0).astype(jnp.bfloat16)
    out3 = jax.block_until_ready(sigmoid_bijector_forward(x3, -1.0, 1.0))
    ref3 = (-1.0 + 2.0 * jax.nn.sigmoid(x3.astype(jnp.float32))).astype(jnp.bfloat16)
    assert out3.shape == x3.shape and out3.dtype == x3.dtype
    assert jnp.max(jnp.abs(out3.astype(jnp.float32) - ref3.astype(jnp.float32))) < 2e-2

    print("KERNEL_OK")
</pallas_src>

<mosaic_0001>
module attributes {stable_mosaic.version = 11 : i64} {
  func.func @_sigmoid_bijector_kernel(%arg0: i32, %arg1: memref<8x256xf32, #tpu.memory_space<vmem>>, %arg2: memref<8x256xf32, #tpu.memory_space<vmem>>) attributes {dimension_semantics = [#tpu.dimension_semantics<parallel>], iteration_bounds = array<i64: 1>, scalar_prefetch = 0 : i64, scratch_operands = 0 : i64, tpu.core_type = #tpu.core_type<tc>, window_params = [{transform_indices = @transform_0, window_bounds = array<i64: 8, 256>}, {transform_indices = @transform_1, window_bounds = array<i64: 8, 256>}]} {
    %c0 = arith.constant 0 : index
    %c0_0 = arith.constant 0 : index
    %0 = vector.load %arg1[%c0, %c0_0] : memref<8x256xf32, #tpu.memory_space<vmem>>, vector<8x256xf32>
    %cst = arith.constant 5.000000e-01 : f32
    %1 = vector.broadcast %cst : f32 to vector<8x256xf32>
    %2 = arith.mulf %1, %0 : vector<8x256xf32>
    %3 = math.tanh %2 : vector<8x256xf32>
    %cst_1 = arith.constant 2.500000e+00 : f32
    %4 = vector.broadcast %cst_1 : f32 to vector<8x256xf32>
    %5 = arith.mulf %4, %3 : vector<8x256xf32>
    %cst_2 = arith.constant 5.000000e-01 : f32
    %6 = vector.broadcast %cst_2 : f32 to vector<8x256xf32>
    %7 = arith.addf %6, %5 : vector<8x256xf32>
    %c0_3 = arith.constant 0 : index
    %c0_4 = arith.constant 0 : index
    %8 = vector.load %arg2[%c0_3, %c0_4] : memref<8x256xf32, #tpu.memory_space<vmem>>, vector<8x256xf32>
    tpu.vector_store %arg2[%c0_3, %c0_4], %7 {strides = array<i32>} : memref<8x256xf32, #tpu.memory_space<vmem>>, vector<8x256xf32>,
    return
  }
  func.func @transform_0(%arg0: i32) -> (i32, i32) {
    %c0_i32 = arith.constant 0 : i32
    %c0_i32_0 = arith.constant 0 : i32
    return %arg0, %c0_i32 : i32, i32
  }
  func.func @transform_1(%arg0: i32) -> (i32, i32) {
    %c0_i32 = arith.constant 0 : i32
    %c0_i32_0 = arith.constant 0 : i32
    return %arg0, %c0_i32 : i32, i32
  }
}

</mosaic_0001>

<bundles_post_ra>
// kernel: tpu_custom_call.1
= control target key start
LH: loop header
LB: loop body
LE: loop exit
PB: predicated region body
PF: predicated region fallthrough
CT: control target
= control target key end

     0   :  { %6 = vsyncpa [#allocation3], 0  ;;  %s116_s0 = inlined_call_operand.hbm [shape: f32[8,256], index: 0, kind: input, shape index: {}]   ;;  %s117_s1 = inlined_call_operand.hbm [shape: f32[8,256], index: 1, kind: output, shape index: {}]  }
   0x1   :  { %7 = vsyncpa [#allocation4], 0  ;;  %s98_s6 = smov [#allocation2]  }
   0x2   :  { %s14_s7 = sshll.u32 %s98_s6, 4  ;;  %s15_s7 = int_to_ptr.vmem [resolvable:$true] %s14_s7 }
   0x3   :  { %s62_s8 = scalar_lea.vmem %s15_s7, 256  ;;  %p67_p1 = scmp.lt.s32.totalorder %s15_s7, %s15_s7 }
   0x4   :  { %p63_p0 = scmp.ne.s32.totalorder %s15_s7, %s62_s8  ;;  %p68_p2 = scmp.lt.s32.totalorder %s62_s8, %s62_s8 }
   0x6   :  { %p69_p3 = por %p68_p2, %p67_p1 }
   0x8   :  { %p70_p4 = pnand %p69_p3, %p63_p0 }
   0xa   :  { %73 = shalt.err (!%p70_p4)
}
   0xb   :  { %17 = dma.hbm_to_vmem [thread:$0]  %s116_s0, 256, %s15_s7, [#allocation3]  }
   0xc   :  { %94 = dma.done.wait [#allocation3], 256  }
   0xd   :  { %95 = vsyncadd [#allocation3], 4294967040  ;;  %v21_v0 = vld [vmem:[#allocation2] sm:$0xff]  ;;  %v22_v1 = vld [vmem:[#allocation2 + $0x8] sm:$0xff]  ;;  %s99_s11 = smov [#allocation5]  }
   0xe   :  { %v23_v2 = vmul.f32 0.5, %v21_v0  ;;  %v24_v3 = vmul.f32 0.5, %v22_v1  ;;  %s39_s12 = sshll.u32 %s99_s11, 4  ;;  %s40_s12 = int_to_ptr.vmem [resolvable:$true] %s39_s12 }
   0xf   :  { %s74_s0 = scalar_lea.vmem %s40_s12, 256  ;;  %p79_p6 = scmp.lt.s32.totalorder %s40_s12, %s40_s12 }
  0x10   :  { %50 = vtanh.f32 %v23_v2  ;;  %p75_p5 = scmp.ne.s32.totalorder %s40_s12, %s74_s0  ;;  %p80_p7 = scmp.lt.s32.totalorder %s74_s0, %s74_s0 }
  0x11   :  { %52 = vtanh.f32 %v24_v3 }
  0x12   :  { %p81_p8 = por %p80_p7, %p79_p6 }
  0x14   :  { %p82_p9 = pnand %p81_p8, %p75_p5 }
  0x1d   :  { %v51_v4 = vpop.eup %50 }
  0x1e   :  { %v53_v5 = vpop.eup %52  ;;  %v27_v6 = vmul.f32 2.5, %v51_v4 }
  0x1f   :  { %v28_v7 = vmul.f32 2.5, %v53_v5 }
  0x20   :  { %v29_v8 = vadd.f32 0.5, %v27_v6 }
  0x21   :  { %v30_v9 = vadd.f32 0.5, %v28_v7 }
  0x22   :  { %31 = vst [vmem:[#allocation5] sm:$0xff] %v29_v8 }
  0x23   :  { %32 = vst [vmem:[#allocation5 + $0x8] sm:$0xff] %v30_v9 }
  0x24   :  { %85 = shalt.err (!%p82_p9)
}
  0x25   :  { %42 = dma.vmem_to_hbm [thread:$0]  %s40_s12, 256, %s117_s1, [#allocation4]  }
  0x26   :  { %96 = dma.done.wait [#allocation4], 256  }
  0x27   :  { %97 = vsyncadd [#allocation4], 4294967040 }
  0x28   :  { %46 = vsyncpa [#allocation3], 1 }
  0x29   :  { %47 = vsyncpa [#allocation4], 1 }

</bundles_post_ra>
